<compile_context>
chip_gen: v5e
topology: v5e:2x2
jax: 0.10.0
libtpu: 0.0.40
codegen_flags: <defaults>
</compile_context>

<pallas_src>
import functools

import jax
import jax.numpy as jnp
from jax.experimental import pallas as pl
from jax.experimental.pallas import tpu as pltpu

_LANES = 128


def _cdiv(a, b):
    return -(-a // b)


def _round_up(a, b):
    return _cdiv(a, b) * b


def _tpu_budget():
    """Return (vmem_limit_bytes, tile_budget_bytes, num_tensorcores)."""
    vmem_bytes = 64 << 20          # conservative default: v7x per-TC VMEM
    num_cores = 1
    try:
        info = pltpu.get_tpu_info()
        v = getattr(info, "vmem_capacity_bytes", None)
        if v:
            vmem_bytes = int(v)
        for name in ("num_tensorcores", "tensorcore_count", "num_cores", "core_count"):
            c = getattr(info, name, None)
            if c:
                num_cores = int(c)
                break
    except Exception:
        pass
    vmem_limit = int(vmem_bytes * 0.85)    # explicit scoped-VMEM limit, with headroom
    tile_budget = int(vmem_bytes * 0.60)   # budget for the streaming row-tile buffers
    return vmem_limit, tile_budget, num_cores


def _choose_tiling(bj, tm_cap, num_cores):
    """Pick (tm, tiles_per_core, num_par, num_real_tiles). tm_cap is a multiple of 8."""
    if bj <= tm_cap:
        return bj, 1, 1, 1
    tm = tm_cap
    num_real = _cdiv(bj, tm)
    num_par = num_cores if (num_cores > 1 and num_real >= num_cores) else 1
    if num_par > 1 and num_real % num_par != 0:
        # Prefer shrinking tm so every core gets the same number of *real* tiles
        # (no fully-masked duplicate tile -> no wasted HBM reads / load imbalance).
        target = _round_up(num_real, num_par)
        tm_bal = _round_up(_cdiv(bj, target), 8)
        if _cdiv(bj, tm_bal) == target:
            tm, num_real = tm_bal, target
        # else: keep tm; the index_map clamp + row mask handle the odd tail tile.
    tiles_per_core = _cdiv(num_real, num_par)
    return tm, tiles_per_core, num_par, num_real


def _joints_mse_kernel(pred_ref, gt_ref, w_ref, out_ref, acc_ref, *,
                       tm, hw, total_rows, tiles_per_core, scale):
    # pred_ref, gt_ref: (tm, HW) row tile of the flattened (B*J, HW) heatmaps
    # w_ref:            (tm, 1) per-row weights for this tile
    # out_ref:          (1, 1) SMEM partial-sum slot for this parallel core
    # acc_ref:          (tm, 128) f32 lane-wide running accumulator
    c = pl.program_id(0)          # parallel (per-core) axis
    i = pl.program_id(1)          # arbitrary (reduction) axis

    @pl.when(i == 0)
    def _init():
        acc_ref[...] = jnp.zeros_like(acc_ref)

    # Logical (unclamped) first row of this tile -- drives the validity mask so
    # both ragged tail rows and fully-duplicated clamped tiles contribute zero.
    row0 = (c * tiles_per_core + i) * tm

    pred = pred_ref[...].astype(jnp.float32)        # (tm, HW)
    gt = gt_ref[...].astype(jnp.float32)            # (tm, HW)
    w = w_ref[...].astype(jnp.float32)              # (tm, 1)

    rows = jax.lax.broadcasted_iota(jnp.int32, (tm, 1), 0) + row0
    valid = rows < total_rows                       # (tm, 1)

    d = jnp.where(valid, (pred - gt) * w, jnp.float32(0.0))
    dsq = d * d                                     # (tm, HW)

    # Lane-wide accumulation: fold HW into 128-lane column chunks with static
    # slices -> pure VPU adds and unmasked full-lane stores in the steady state.
    n_full = hw // _LANES
    for blk in range(n_full):
        acc_ref[...] += dsq[:, blk * _LANES:(blk + 1) * _LANES]
    rem = hw - n_full * _LANES
    if rem:
        acc_ref[:, :rem] += dsq[:, n_full * _LANES:]

    @pl.when(i == tiles_per_core - 1)
    def _finalize():
        # Single cross-lane/sublane reduce + scaling, once per core.
        out_ref[0, 0] = jnp.sum(acc_ref[...]) * scale


def joints_mse_loss(output, target, target_weight, *,
                    min_pallas_bytes=512 * 1024,
                    tile_budget_bytes=None,
                    num_cores=None,
                    vmem_limit_bytes=None):
    """output, target: (B, J, H, W); target_weight: (B, J, 1). Returns scalar f32."""
    B, J, H, W = output.shape
    BJ, HW = B * J, H * W
    itemsize = jnp.dtype(output.dtype).itemsize

    # Small-problem fast path: kernel-launch/grid overhead dominates; XLA fuses
    # this trivial reduction more cheaply than a custom kernel.
    if 2 * BJ * HW * itemsize < min_pallas_bytes:
        w = target_weight.reshape(BJ, 1).astype(jnp.float32)
        d = (output.astype(jnp.float32)
             - target.astype(jnp.float32)).reshape(BJ, HW) * w
        return 0.5 * jnp.mean(jnp.square(d))

    auto_limit, auto_budget, auto_cores = _tpu_budget()
    vmem_limit = int(vmem_limit_bytes or auto_limit)
    tile_budget = int(tile_budget_bytes or auto_budget)
    n_cores = int(num_cores or auto_cores)

    # Free views -- no transposes, no data movement before the kernel.
    pred = output.reshape(BJ, HW)
    gt = target.reshape(BJ, HW)
    w = target_weight.reshape(BJ, 1)

    # Per-row VMEM cost of one tile: pred + gt (2 pipeline buffers each), the
    # lane-padded (tm, 1) weight block (2 buffers), and the (tm, 128) f32 acc.
    w_itemsize = jnp.dtype(target_weight.dtype).itemsize
    per_row = 2 * 2 * HW * itemsize
    per_row += 2 * _LANES * w_itemsize
    per_row += _LANES * 4
    cap_rows = max(8, tile_budget // per_row)
    tm_cap = max(8, (int(cap_rows) // 8) * 8)

    tm, tiles_per_core, num_par, num_real = _choose_tiling(BJ, tm_cap, n_cores)
    scale = 0.5 / float(BJ * HW)

    def pg_map(c, i):
        # Clamp so a trailing (fully masked) logical tile still maps to a valid
        # block; its contribution is zeroed by the row mask in the kernel.
        return (jnp.minimum(c * tiles_per_core + i, num_real - 1), 0)

    kernel = functools.partial(
        _joints_mse_kernel, tm=tm, hw=HW, total_rows=BJ,
        tiles_per_core=tiles_per_core, scale=scale)

    partials = pl.pallas_call(
        kernel,
        out_shape=jax.ShapeDtypeStruct((num_par, 1), jnp.float32),
        grid_spec=pltpu.PrefetchScalarGridSpec(
            num_scalar_prefetch=0,
            grid=(num_par, tiles_per_core),
            in_specs=[
                pl.BlockSpec((tm, HW), pg_map),     # pred row tile
                pl.BlockSpec((tm, HW), pg_map),     # gt row tile
                pl.BlockSpec((tm, 1), pg_map),      # per-row weights
            ],
            out_specs=pl.BlockSpec((1, 1), lambda c, i: (c, 0),
                                   memory_space=pltpu.SMEM),
            scratch_shapes=[pltpu.VMEM((tm, _LANES), jnp.float32)],
        ),
        compiler_params=pltpu.CompilerParams(
            dimension_semantics=("parallel", "arbitrary"),
            vmem_limit_bytes=vmem_limit),
    )(pred, gt, w)

    return jnp.sum(partials)


def _reference(output, target, target_weight):
    # Pure-JAX reference mirroring the PyTorch per-joint loop.
    B, J, H, W = output.shape
    pred = output.reshape(B, J, -1)
    gt = target.reshape(B, J, -1)
    loss = 0.0
    for idx in range(J):
        w = target_weight[:, idx]                 # (B, 1)
        hp = pred[:, idx, :] * w
        hg = gt[:, idx, :] * w
        loss += 0.5 * jnp.mean((hp - hg) ** 2)
    return loss / J


if __name__ == "__main__":
    key = jax.random.PRNGKey(0)
    k1, k2, k3, k4, k5, k6 = jax.random.split(key, 6)

    # Case 1: nominal small shape, forced through the Pallas kernel.
    B, J, H, W = 2, 4, 16, 16
    output = jax.random.normal(k1, (B, J, H, W), dtype=jnp.float32)
    target = jax.random.normal(k2, (B, J, H, W), dtype=jnp.float32)
    tw = jax.random.uniform(k3, (B, J, 1), dtype=jnp.float32)
    loss = jax.block_until_ready(
        joints_mse_loss(output, target, tw, min_pallas_bytes=0))
    ref = _reference(output, target, tw)
    assert jnp.allclose(loss, ref, rtol=1e-4, atol=1e-6), (loss, ref)

    # Case 1b: default call takes the small-problem fast path (plain jnp).
    loss_fp = jax.block_until_ready(joints_mse_loss(output, target, tw))
    assert jnp.allclose(loss_fp, ref, rtol=1e-4, atol=1e-6), (loss_fp, ref)

    # Case 2: multi-tile, 2-way parallel path with a ragged + clamped tail tile.
    B2, J2, H2, W2 = 3, 7, 8, 16   # BJ=21, HW=128
    out2 = jax.random.normal(k4, (B2, J2, H2, W2), dtype=jnp.float32)
    tgt2 = jax.random.normal(k5, (B2, J2, H2, W2), dtype=jnp.float32)
    tw2 = (jax.random.uniform(k6, (B2, J2, 1)) > 0.3).astype(jnp.float32)
    loss2 = jax.block_until_ready(
        joints_mse_loss(out2, tgt2, tw2, min_pallas_bytes=0,
                        tile_budget_bytes=32 * 1024, num_cores=2))
    ref2 = _reference(out2, tgt2, tw2)
    assert jnp.allclose(loss2, ref2, rtol=1e-4, atol=1e-6), (loss2, ref2)

    # Case 3: balanced 2-core split (tm shrunk so both cores get equal real tiles).
    k7, k8, k9 = jax.random.split(k6, 3)
    B3, J3, H3, W3 = 6, 15, 8, 16  # BJ=90, HW=128
    out3 = jax.random.normal(k7, (B3, J3, H3, W3), dtype=jnp.float32)
    tgt3 = jax.random.normal(k8, (B3, J3, H3, W3), dtype=jnp.float32)
    tw3 = jax.random.uniform(k9, (B3, J3, 1), dtype=jnp.float32)
    loss3 = jax.block_until_ready(
        joints_mse_loss(out3, tgt3, tw3, min_pallas_bytes=0,
                        tile_budget_bytes=145 * 1024, num_cores=2))
    ref3 = _reference(out3, tgt3, tw3)
    assert jnp.allclose(loss3, ref3, rtol=1e-4, atol=1e-6), (loss3, ref3)

    print("KERNEL_OK")
</pallas_src>

<mosaic_0001>
module attributes {stable_mosaic.version = 11 : i64} {
  func.func @_joints_mse_kernel(%arg0: i32, %arg1: i32, %arg2: memref<8x256xf32, #tpu.memory_space<vmem>>, %arg3: memref<8x256xf32, #tpu.memory_space<vmem>>, %arg4: memref<8x1xf32, #tpu.memory_space<vmem>>, %arg5: memref<1x1xf32, #tpu.memory_space<smem>>, %arg6: memref<8x128xf32, #tpu.memory_space<vmem>>) attributes {dimension_semantics = [#tpu.dimension_semantics<parallel>, #tpu.dimension_semantics<arbitrary>], iteration_bounds = array<i64: 1, 1>, scalar_prefetch = 0 : i64, scratch_operands = 1 : i64, tpu.core_type = #tpu.core_type<tc>, window_params = [{transform_indices = @transform_0, window_bounds = array<i64: 8, 256>}, {transform_indices = @transform_1, window_bounds = array<i64: 8, 256>}, {transform_indices = @transform_2, window_bounds = array<i64: 8, 1>}, {transform_indices = @transform_3, window_bounds = array<i64: 1, 1>}]} {
    %c0_i32 = arith.constant 0 : i32
    %0 = arith.cmpi eq, %arg1, %c0_i32 : i32
    %1 = arith.extui %0 : i1 to i32
    %c0_i32_0 = arith.constant 0 : i32
    %2 = arith.cmpi ne, %1, %c0_i32_0 : i32
    scf.if %2 {
      %cst_17 = arith.constant 0.000000e+00 : f32
      %33 = vector.broadcast %cst_17 : f32 to vector<8x128xf32>
      %c0_18 = arith.constant 0 : index
      %c0_19 = arith.constant 0 : index
      %34 = vector.load %arg6[%c0_18, %c0_19] : memref<8x128xf32, #tpu.memory_space<vmem>>, vector<8x128xf32>
      tpu.vector_store %arg6[%c0_18, %c0_19], %33 {strides = array<i32>} : memref<8x128xf32, #tpu.memory_space<vmem>>, vector<8x128xf32>,
    } else {
    }
    %c1_i32 = arith.constant 1 : i32
    %3 = arith.muli %arg0, %c1_i32 : i32
    %4 = arith.addi %3, %arg1 : i32
    %c8_i32 = arith.constant 8 : i32
    %5 = arith.muli %4, %c8_i32 : i32
    %c0 = arith.constant 0 : index
    %c0_1 = arith.constant 0 : index
    %6 = vector.load %arg2[%c0, %c0_1] : memref<8x256xf32, #tpu.memory_space<vmem>>, vector<8x256xf32>
    %c0_2 = arith.constant 0 : index
    %c0_3 = arith.constant 0 : index
    %7 = vector.load %arg3[%c0_2, %c0_3] : memref<8x256xf32, #tpu.memory_space<vmem>>, vector<8x256xf32>
    %c0_4 = arith.constant 0 : index
    %c0_5 = arith.constant 0 : index
    %8 = vector.load %arg4[%c0_4, %c0_5] : memref<8x1xf32, #tpu.memory_space<vmem>>, vector<8x1xf32>
    %9 = tpu.iota {dimensions = array<i32: 0>} : vector<8x1xi32>
    %10 = vector.broadcast %5 : i32 to vector<8x1xi32>
    %11 = arith.addi %9, %10 : vector<8x1xi32>
    %c8_i32_6 = arith.constant 8 : i32
    %12 = vector.broadcast %c8_i32_6 : i32 to vector<8x1xi32>
    %13 = arith.cmpi slt, %11, %12 : vector<8x1xi32>
    %14 = arith.subf %6, %7 : vector<8x256xf32>
    %15 = vector.broadcast %8 : vector<8x1xf32> to vector<8x256xf32>
    %16 = arith.mulf %14, %15 : vector<8x256xf32>
    %cst = arith.constant 0.000000e+00 : f32
    %17 = vector.shape_cast %13 : vector<8x1xi1> to vector<8x1xi1>
    %18 = vector.broadcast %17 : vector<8x1xi1> to vector<8x256xi1>
    %19 = vector.broadcast %cst : f32 to vector<8x256xf32>
    %20 = arith.select %18, %16, %19 : vector<8x256xi1>, vector<8x256xf32>
    %21 = arith.mulf %20, %20 : vector<8x256xf32>
    %c0_7 = arith.constant 0 : index
    %c0_8 = arith.constant 0 : index
    %22 = vector.load %arg6[%c0_7, %c0_8] : memref<8x128xf32, #tpu.memory_space<vmem>>, vector<8x128xf32>
    %23 = vector.extract_strided_slice %21 {offsets = [0, 0], sizes = [8, 128], strides = [1, 1]} : vector<8x256xf32> to vector<8x128xf32>
    %24 = arith.addf %22, %23 : vector<8x128xf32>
    %c0_9 = arith.constant 0 : index
    %c0_10 = arith.constant 0 : index
    %25 = vector.load %arg6[%c0_9, %c0_10] : memref<8x128xf32, #tpu.memory_space<vmem>>, vector<8x128xf32>
    tpu.vector_store %arg6[%c0_9, %c0_10], %24 {strides = array<i32>} : memref<8x128xf32, #tpu.memory_space<vmem>>, vector<8x128xf32>,
    %c0_11 = arith.constant 0 : index
    %c0_12 = arith.constant 0 : index
    %26 = vector.load %arg6[%c0_11, %c0_12] : memref<8x128xf32, #tpu.memory_space<vmem>>, vector<8x128xf32>
    %27 = vector.extract_strided_slice %21 {offsets = [0, 128], sizes = [8, 128], strides = [1, 1]} : vector<8x256xf32> to vector<8x128xf32>
    %28 = arith.addf %26, %27 : vector<8x128xf32>
    %c0_13 = arith.constant 0 : index
    %c0_14 = arith.constant 0 : index
    %29 = vector.load %arg6[%c0_13, %c0_14] : memref<8x128xf32, #tpu.memory_space<vmem>>, vector<8x128xf32>
    tpu.vector_store %arg6[%c0_13, %c0_14], %28 {strides = array<i32>} : memref<8x128xf32, #tpu.memory_space<vmem>>, vector<8x128xf32>,
    %c0_i32_15 = arith.constant 0 : i32
    %30 = arith.cmpi eq, %arg1, %c0_i32_15 : i32
    %31 = arith.extui %30 : i1 to i32
    %c0_i32_16 = arith.constant 0 : i32
    %32 = arith.cmpi ne, %31, %c0_i32_16 : i32
    scf.if %32 {
      %c0_17 = arith.constant 0 : index
      %c0_18 = arith.constant 0 : index
      %33 = vector.load %arg6[%c0_17, %c0_18] : memref<8x128xf32, #tpu.memory_space<vmem>>, vector<8x128xf32>
      %34 = vector.shape_cast %33 : vector<8x128xf32> to vector<1x8x128xf32>
      %cst_19 = arith.constant dense<0.000000e+00> : vector<1xf32>
      %35 = vector.multi_reduction <add>, %34, %cst_19 [1, 2] : vector<1x8x128xf32> to vector<1xf32>
      %36 = vector.shape_cast %35 : vector<1xf32> to vector<1x1x1xf32>
      %37 = vector.extract %36[0, 0, 0] : f32 from vector<1x1x1xf32>
      %cst_20 = arith.constant 2.44140625E-4 : f32
      %38 = arith.mulf %37, %cst_20 : f32
      %c0_21 = arith.constant 0 : index
      %c0_22 = arith.constant 0 : index
      %39 = memref.load %arg5[%c0_21, %c0_22] : memref<1x1xf32, #tpu.memory_space<smem>>
      memref.store %38, %arg5[%c0_21, %c0_22] : memref<1x1xf32, #tpu.memory_space<smem>>
    } else {
    }
    return
  }
  func.func @transform_0(%arg0: i32, %arg1: i32) -> (i32, i32) {
    %c1_i32 = arith.constant 1 : i32
    %0 = arith.muli %arg0, %c1_i32 : i32
    %1 = arith.addi %0, %arg1 : i32
    %c0_i32 = arith.constant 0 : i32
    %2 = arith.minsi %1, %c0_i32 : i32
    %c0_i32_0 = arith.constant 0 : i32
    %c0_i32_1 = arith.constant 0 : i32
    return %2, %c0_i32_0 : i32, i32
  }
  func.func @transform_1(%arg0: i32, %arg1: i32) -> (i32, i32) {
    %c1_i32 = arith.constant 1 : i32
    %0 = arith.muli %arg0, %c1_i32 : i32
    %1 = arith.addi %0, %arg1 : i32
    %c0_i32 = arith.constant 0 : i32
    %2 = arith.minsi %1, %c0_i32 : i32
    %c0_i32_0 = arith.constant 0 : i32
    %c0_i32_1 = arith.constant 0 : i32
    return %2, %c0_i32_0 : i32, i32
  }
  func.func @transform_2(%arg0: i32, %arg1: i32) -> (i32, i32) {
    %c1_i32 = arith.constant 1 : i32
    %0 = arith.muli %arg0, %c1_i32 : i32
    %1 = arith.addi %0, %arg1 : i32
    %c0_i32 = arith.constant 0 : i32
    %2 = arith.minsi %1, %c0_i32 : i32
    %c0_i32_0 = arith.constant 0 : i32
    %c0_i32_1 = arith.constant 0 : i32
    return %2, %c0_i32_0 : i32, i32
  }
  func.func @transform_3(%arg0: i32, %arg1: i32) -> (i32, i32) {
    %c0_i32 = arith.constant 0 : i32
    %c0_i32_0 = arith.constant 0 : i32
    return %arg0, %c0_i32 : i32, i32
  }
}

</mosaic_0001>

<bundles_post_ra>
// kernel: tpu_custom_call.1
= control target key start
LH: loop header
LB: loop body
LE: loop exit
PB: predicated region body
PF: predicated region fallthrough
CT: control target
= control target key end

     0   :  { %8 = vsyncpa [#allocation4], 0  ;;  %s278_s0 = inlined_call_operand.hbm [shape: f32[8,256], index: 0, kind: input, shape index: {}]   ;;  %s279_s1 = inlined_call_operand.hbm [shape: f32[8,256], index: 1, kind: input, shape index: {}]   ;;  %s280_s2 = inlined_call_operand.vmem [shape: f32[8,1], index: 2, kind: input, shape index: {}]   ;;  %s281_s3 = inlined_call_operand.hbm [shape: f32[1,1], index: 3, kind: output, shape index: {}]  }
   0x1   :  { %9 = vsyncpa [#allocation7], 0 }
   0x2   :  { %10 = vsyncpa [#allocation5], 0  ;;  %s22_s14 = sshll.u32 %s278_s0, 4  ;;  %s242_s15 = smov [#allocation3]   ;;  %s23_s14 = int_to_ptr.hbm [resolvable:$true] %s22_s14 }
   0x3   :  { %s24_s16 = sshll.u32 %s242_s15, 4  ;;  %s39_s19 = sshll.u32 %s279_s1, 4  ;;  %s25_s16 = int_to_ptr.vmem [resolvable:$true] %s24_s16  ;;  %s40_s19 = int_to_ptr.hbm [resolvable:$true] %s39_s19 }
   0x4   :  { %27 = dma.hbm_to_vmem [thread:$0]  %s23_s14, 256, %s25_s16, [#allocation4]  }
   0x5   :  { %s243_s20 = smov [#allocation6]  }
   0x6   :  { %s41_s21 = sshll.u32 %s243_s20, 4  ;;  %s42_s21 = int_to_ptr.vmem [resolvable:$true] %s41_s21 }
   0x7   :  { %44 = dma.hbm_to_vmem [thread:$0]  %s40_s19, 256, %s42_s21, [#allocation7]  }
   0x8   :  { %236 = dma.done.wait [#allocation4], 256  }
   0x9   :  { %237 = vsyncadd [#allocation4], 4294967040 }
   0xa   :  { %238 = dma.done.wait [#allocation7], 256  }
   0xb   :  { %239 = vsyncadd [#allocation7], 4294967040  ;;  %v244_v0 = vmov 0   ;;  %v99_v1 = vld [vmem:[%s280_s2] sm:$0xff]  ;;  %v96_v3 = vld [vmem:[#allocation3 + $0x8] sm:$0xff]  ;;  %s147_s23 = sshll.u32 %s281_s3, 4  ;;  %s148_s23 = int_to_ptr.hbm [resolvable:$true] %s147_s23 }
   0xc   :  { %175 = vset.pattern.permute.xlu0 %v244_v0  ;;  %v95_v2 = vld [vmem:[#allocation3] sm:$0xff]  ;;  %v97_v4 = vld [vmem:[#allocation6] sm:$0xff]  ;;  %v98_v5 = vld [vmem:[#allocation6 + $0x8] sm:$0xff]  ;;  %s245_s26 = smov [#allocation8]  }
   0xd   :  { %109 = vperm.xlu0 %175, %v99_v1   ;;  %v105_v6 = vsub.f32 %v95_v2, %v97_v4  ;;  %v106_v7 = vsub.f32 %v96_v3, %v98_v5 }
  0x7f   :  { %v110_v8 = vpop.permute.xlu0 %109 }
  0x80   :  { %v112_v9 = vmul.f32 %v110_v8, %v105_v6  ;;  %v113_v10 = vmul.f32 %v110_v8, %v106_v7 }
  0x82   :  { %v118_v11 = vmul.f32 %v112_v9, %v112_v9  ;;  %v119_v12 = vmul.f32 %v113_v10, %v113_v10 }
  0x84   :  { %v124_v13 = vadd.f32 %v119_v12, %v118_v11 }
  0x86   :  { %130 = vadd.xlane.f32.xlu0 %v124_v13 }
  0xf9   :  { %v131_v14 = vpop.xlane.xlu0 %130 }
  0xfa   :  { %v132_v15 = vrot.slane %v131_v14, 4 }
  0xfc   :  { %v133_v16 = vadd.f32 %v132_v15, %v131_v14 }
  0xfe   :  { %v134_v17 = vrot.slane %v133_v16, 2 }
 0x100   :  { %v135_v18 = vadd.f32 %v134_v17, %v133_v16 }
 0x102   :  { %v136_v19 = vrot.slane %v135_v18, 1 }
 0x104   :  { %v137_v20 = vadd.f32 %v136_v19, %v135_v18 }
 0x106   :  { %169 = vpush %v137_v20 }
 0x137   :  { %s170_s24 = spop %169 }
 0x138   :  { %s139_s25 = smul.f32 0.00024414063, %s170_s24 }
 0x13a   :  { %141 = sst [smem:[#allocation8]] %s139_s25 }
 0x13b   :  { %150 = dma.smem_to_hbm %s245_s26, 16, %s148_s23, [#allocation5]  }
 0x13c   :  { %240 = dma.done.wait [#allocation5], 16  }
 0x13d   :  { %241 = vsyncadd [#allocation5], 4294967280 }
 0x13e   :  { %155 = sfence }
 0x13f   :  { %156 = vsyncpa [#allocation4], 1 }
 0x140   :  { %157 = vsyncpa [#allocation7], 1 }
 0x141   :  { %158 = vsyncpa [#allocation5], 1 }

</bundles_post_ra>
